<compile_context>
chip_gen: v6e
topology: v6e:2x2x1
jax: 0.10.0
libtpu: 0.0.40
codegen_flags: <defaults>
</compile_context>

<pallas_src>
import jax
import jax.numpy as jnp
from jax.experimental import pallas as pl
from jax.experimental.pallas import tpu as pltpu


# ---------------- Stage 1: per-row scores ----------------
# s[:, 0] = relu(x@W1+b1) @ V[:, 0] + c[0]   (left score, bd folded in)
# s[:, 1] = relu(x@W1+b1) @ V[:, 1] + c[1]   (right score)
def _score_kernel(x_ref, w1_ref, b1_ref, v_ref, c_ref, s_ref):
    x = x_ref[0]                                                        # (TS, D_in)
    h = jnp.dot(x, w1_ref[...], preferred_element_type=jnp.float32) + b1_ref[...]
    h = jnp.maximum(h, 0.0)                                             # (TS, 64)
    s_ref[0] = jnp.dot(h, v_ref[...], preferred_element_type=jnp.float32) + c_ref[...]


# ---------------- Stage 2: tiled broadcast-add ----------------
def _tile_kernel(sl_ref, sr_ref, o_ref):
    # (TI, 1) + (1, TJ) -> (TI, TJ): pure VPU add + lane-dense store.
    o_ref[0] = sl_ref[0] + sr_ref[0]


@jax.jit
def distance_matrix_predictor(x, params):
    """x: (B, L, D_in) float32. Returns (B, L, L) float32."""
    B, L, D_in = x.shape
    w1, b1, w2, b2, wd, bd = (params["w1"], params["b1"], params["w2"],
                              params["b2"], params["wd"], params["bd"])
    H1, H2 = w1.shape[1], w2.shape[1]                        # 64, 32

    # Fold second Linear + distance head into a single (H1, 2) projection.
    wd_lr = jnp.concatenate([wd[:H2, :], wd[H2:, :]], axis=1)            # (32, 2)
    v = w2 @ wd_lr                                                       # (64, 2)
    c = b2 @ wd_lr + jnp.concatenate([bd, jnp.zeros_like(bd)])           # (2,)
    b1_2d = b1.reshape(1, H1)
    c_2d = c.reshape(1, 2)

    # Tile selection: full-dim blocks when L fits (always legal regardless of
    # divisibility); otherwise large (8,128)-aligned tiles with cdiv grids and
    # edge-block clipping.  4 MiB output tile (8 MiB double-buffered) fits all
    # generations given the explicit 32 MiB vmem limit below.
    TI = L if L <= 512 else 512        # sublane (rows)
    TJ = L if L <= 2048 else 2048      # lane-dense (cols)
    TS = L if L <= 256 else 256        # stage-1 row tile
    n_i, n_j, n_s = pl.cdiv(L, TI), pl.cdiv(L, TJ), pl.cdiv(L, TS)

    # ---- stage 1: (B, L, 2) row scores ----
    s = pl.pallas_call(
        _score_kernel,
        out_shape=jax.ShapeDtypeStruct((B, L, 2), jnp.float32),
        grid_spec=pltpu.PrefetchScalarGridSpec(
            num_scalar_prefetch=0,
            grid=(B, n_s),
            in_specs=[
                pl.BlockSpec((1, TS, D_in), lambda b, i: (b, i, 0)),   # x row-tile
                pl.BlockSpec((D_in, H1), lambda b, i: (0, 0)),         # W1
                pl.BlockSpec((1, H1), lambda b, i: (0, 0)),            # b1
                pl.BlockSpec((H1, 2), lambda b, i: (0, 0)),            # folded V
                pl.BlockSpec((1, 2), lambda b, i: (0, 0)),             # folded c
            ],
            out_specs=pl.BlockSpec((1, TS, 2), lambda b, i: (b, i, 0)),
        ),
        compiler_params=pltpu.CompilerParams(
            dimension_semantics=("parallel", "parallel")),
    )(x, w1, b1_2d, v, c_2d)

    # Tiny layout plumbing (B*L*4 bytes each): left scores as a column, right
    # scores as a row, so the stage-2 body is a broadcast-add with no relayout.
    s_left = s[:, :, 0:1]                          # (B, L, 1)
    s_right = jnp.swapaxes(s[:, :, 1:2], 1, 2)     # (B, 1, L)

    # ---- stage 2: (B, L, L) distance matrix, lane-dense tiles, no padding ----
    d = pl.pallas_call(
        _tile_kernel,
        out_shape=jax.ShapeDtypeStruct((B, L, L), jnp.float32),
        grid_spec=pltpu.PrefetchScalarGridSpec(
            num_scalar_prefetch=0,
            grid=(B, n_i, n_j),
            in_specs=[
                pl.BlockSpec((1, TI, 1), lambda b, i, j: (b, i, 0)),
                pl.BlockSpec((1, 1, TJ), lambda b, i, j: (b, 0, j)),
            ],
            out_specs=pl.BlockSpec((1, TI, TJ), lambda b, i, j: (b, i, j)),
        ),
        compiler_params=pltpu.CompilerParams(
            dimension_semantics=("parallel", "parallel", "parallel"),
            vmem_limit_bytes=32 * 1024 * 1024),
        cost_estimate=pl.CostEstimate(
            flops=B * L * L,
            transcendentals=0,
            bytes_accessed=4 * B * L * L + 8 * B * L),
    )(s_left, s_right)

    return d


def init_params(key, input_dim=20):
    """Deterministic init matching the nn.Module's parameter shapes."""
    ks = jax.random.split(key, 6)
    def lin(kw, kb, fan_in, fan_out):
        bound = 1.0 / jnp.sqrt(fan_in)
        w = jax.random.uniform(kw, (fan_in, fan_out), jnp.float32, -bound, bound)
        b = jax.random.uniform(kb, (fan_out,), jnp.float32, -bound, bound)
        return w, b
    w1, b1 = lin(ks[0], ks[1], input_dim, 64)
    w2, b2 = lin(ks[2], ks[3], 64, 32)
    wd, bd = lin(ks[4], ks[5], 64, 1)
    return {"w1": w1, "b1": b1, "w2": w2, "b2": b2, "wd": wd, "bd": bd}


def _reference(x, p):
    h = jnp.maximum(x @ p["w1"] + p["b1"], 0.0)
    f = h @ p["w2"] + p["b2"]
    B, L, _ = x.shape
    left = jnp.broadcast_to(f[:, :, None, :], (B, L, L, f.shape[-1]))
    right = jnp.broadcast_to(f[:, None, :, :], (B, L, L, f.shape[-1]))
    pairwise = jnp.concatenate([left, right], axis=-1)
    return (pairwise @ p["wd"] + p["bd"])[..., 0]


if __name__ == "__main__":
    key = jax.random.PRNGKey(0)
    k_param, k_x1, k_x2 = jax.random.split(key, 3)
    D_in = 20
    params = init_params(k_param, input_dim=D_in)

    # Small canonical case (single full-dim block per batch).
    B, L = 2, 8
    x = jax.random.normal(k_x1, (B, L, D_in), dtype=jnp.float32)
    out = jax.block_until_ready(distance_matrix_predictor(x, params))
    ref = _reference(x, params)
    assert out.shape == (B, L, L)
    assert jnp.allclose(out, ref, atol=1e-4, rtol=1e-4), "mismatch vs reference (L=8)"

    # Non-multiple-of-128 case: exercises edge-block clipping (no padding/crop).
    B2, L2 = 1, 300
    x2 = jax.random.normal(k_x2, (B2, L2, D_in), dtype=jnp.float32)
    out2 = jax.block_until_ready(distance_matrix_predictor(x2, params))
    ref2 = _reference(x2, params)
    assert out2.shape == (B2, L2, L2)
    assert jnp.allclose(out2, ref2, atol=1e-4, rtol=1e-4), "mismatch vs reference (L=300)"

    print("KERNEL_OK")
</pallas_src>

<mosaic_0001>
module attributes {stable_mosaic.version = 11 : i64} {
  func.func @_score_kernel(%arg0: i32, %arg1: i32, %arg2: memref<1x8x20xf32, #tpu.memory_space<vmem>>, %arg3: memref<20x64xf32, #tpu.memory_space<vmem>>, %arg4: memref<1x64xf32, #tpu.memory_space<vmem>>, %arg5: memref<64x2xf32, #tpu.memory_space<vmem>>, %arg6: memref<1x2xf32, #tpu.memory_space<vmem>>, %arg7: memref<1x8x2xf32, #tpu.memory_space<vmem>>) attributes {dimension_semantics = [#tpu.dimension_semantics<parallel>, #tpu.dimension_semantics<parallel>], iteration_bounds = array<i64: 2, 1>, scalar_prefetch = 0 : i64, scratch_operands = 0 : i64, tpu.core_type = #tpu.core_type<tc>, window_params = [{transform_indices = @transform_0, window_bounds = array<i64: 1, 8, 20>}, {pipeline_mode = #tpu.pipeline_mode<synchronous>, transform_indices = @transform_1, window_bounds = array<i64: 20, 64>}, {pipeline_mode = #tpu.pipeline_mode<synchronous>, transform_indices = @transform_2, window_bounds = array<i64: 1, 64>}, {pipeline_mode = #tpu.pipeline_mode<synchronous>, transform_indices = @transform_3, window_bounds = array<i64: 64, 2>}, {pipeline_mode = #tpu.pipeline_mode<synchronous>, transform_indices = @transform_4, window_bounds = array<i64: 1, 2>}, {transform_indices = @transform_5, window_bounds = array<i64: 1, 8, 2>}]} {
    %c0 = arith.constant 0 : index
    %c0_0 = arith.constant 0 : index
    %c0_1 = arith.constant 0 : index
    %0 = vector.load %arg2[%c0, %c0_0, %c0_1] : memref<1x8x20xf32, #tpu.memory_space<vmem>>, vector<1x8x20xf32>
    %1 = vector.shape_cast %0 : vector<1x8x20xf32> to vector<8x20xf32>
    %c0_2 = arith.constant 0 : index
    %c0_3 = arith.constant 0 : index
    %2 = vector.load %arg3[%c0_2, %c0_3] : memref<20x64xf32, #tpu.memory_space<vmem>>, vector<20x64xf32>
    %cst = arith.constant dense<0.000000e+00> : vector<8x64xf32>
    %3 = tpu.matmul %1, %2, %cst {dimension_numbers = #tpu.dot_dimension_numbers<[1], [0], [0], [1], [0, 0, 1, 1], [], []>} : vector<8x20xf32>, vector<20x64xf32>, vector<8x64xf32> -> vector<8x64xf32>
    %c0_4 = arith.constant 0 : index
    %c0_5 = arith.constant 0 : index
    %4 = vector.load %arg4[%c0_4, %c0_5] : memref<1x64xf32, #tpu.memory_space<vmem>>, vector<1x64xf32>
    %5 = vector.broadcast %4 : vector<1x64xf32> to vector<8x64xf32>
    %6 = arith.addf %3, %5 : vector<8x64xf32>
    %cst_6 = arith.constant 0.000000e+00 : f32
    %7 = vector.broadcast %cst_6 : f32 to vector<8x64xf32>
    %8 = arith.maximumf %6, %7 : vector<8x64xf32>
    %c0_7 = arith.constant 0 : index
    %c0_8 = arith.constant 0 : index
    %9 = vector.load %arg5[%c0_7, %c0_8] : memref<64x2xf32, #tpu.memory_space<vmem>>, vector<64x2xf32>
    %cst_9 = arith.constant dense<0.000000e+00> : vector<8x2xf32>
    %10 = tpu.matmul %8, %9, %cst_9 {dimension_numbers = #tpu.dot_dimension_numbers<[1], [0], [0], [1], [0, 0, 1, 1], [], []>} : vector<8x64xf32>, vector<64x2xf32>, vector<8x2xf32> -> vector<8x2xf32>
    %c0_10 = arith.constant 0 : index
    %c0_11 = arith.constant 0 : index
    %11 = vector.load %arg6[%c0_10, %c0_11] : memref<1x2xf32, #tpu.memory_space<vmem>>, vector<1x2xf32>
    %12 = vector.broadcast %11 : vector<1x2xf32> to vector<8x2xf32>
    %13 = arith.addf %10, %12 : vector<8x2xf32>
    %c0_12 = arith.constant 0 : index
    %c0_13 = arith.constant 0 : index
    %c0_14 = arith.constant 0 : index
    %14 = vector.load %arg7[%c0_12, %c0_13, %c0_14] : memref<1x8x2xf32, #tpu.memory_space<vmem>>, vector<1x8x2xf32>
    %15 = vector.shape_cast %14 : vector<1x8x2xf32> to vector<8x2xf32>
    %16 = vector.shape_cast %13 : vector<8x2xf32> to vector<1x8x2xf32>
    tpu.vector_store %arg7[%c0_12, %c0_13, %c0_14], %16 {strides = array<i32>} : memref<1x8x2xf32, #tpu.memory_space<vmem>>, vector<1x8x2xf32>,
    return
  }
  func.func @transform_0(%arg0: i32, %arg1: i32) -> (i32, i32, i32) {
    %c0_i32 = arith.constant 0 : i32
    %c0_i32_0 = arith.constant 0 : i32
    return %arg0, %arg1, %c0_i32 : i32, i32, i32
  }
  func.func @transform_1(%arg0: i32, %arg1: i32) -> (i32, i32) {
    %c0_i32 = arith.constant 0 : i32
    %c0_i32_0 = arith.constant 0 : i32
    %c0_i32_1 = arith.constant 0 : i32
    return %c0_i32, %c0_i32_0 : i32, i32
  }
  func.func @transform_2(%arg0: i32, %arg1: i32) -> (i32, i32) {
    %c0_i32 = arith.constant 0 : i32
    %c0_i32_0 = arith.constant 0 : i32
    %c0_i32_1 = arith.constant 0 : i32
    return %c0_i32, %c0_i32_0 : i32, i32
  }
  func.func @transform_3(%arg0: i32, %arg1: i32) -> (i32, i32) {
    %c0_i32 = arith.constant 0 : i32
    %c0_i32_0 = arith.constant 0 : i32
    %c0_i32_1 = arith.constant 0 : i32
    return %c0_i32, %c0_i32_0 : i32, i32
  }
  func.func @transform_4(%arg0: i32, %arg1: i32) -> (i32, i32) {
    %c0_i32 = arith.constant 0 : i32
    %c0_i32_0 = arith.constant 0 : i32
    %c0_i32_1 = arith.constant 0 : i32
    return %c0_i32, %c0_i32_0 : i32, i32
  }
  func.func @transform_5(%arg0: i32, %arg1: i32) -> (i32, i32, i32) {
    %c0_i32 = arith.constant 0 : i32
    %c0_i32_0 = arith.constant 0 : i32
    return %arg0, %arg1, %c0_i32 : i32, i32, i32
  }
}

module attributes {stable_mosaic.version = 11 : i64} {
  func.func @_tile_kernel(%arg0: i32, %arg1: i32, %arg2: i32, %arg3: memref<1x8x1xf32, #tpu.memory_space<vmem>>, %arg4: memref<1x1x8xf32, #tpu.memory_space<vmem>>, %arg5: memref<1x8x8xf32, #tpu.memory_space<vmem>>) attributes {dimension_semantics = [#tpu.dimension_semantics<parallel>, #tpu.dimension_semantics<parallel>, #tpu.dimension_semantics<parallel>], iteration_bounds = array<i64: 2, 1, 1>, scalar_prefetch = 0 : i64, scratch_operands = 0 : i64, tpu.core_type = #tpu.core_type<tc>, window_params = [{transform_indices = @transform_0, window_bounds = array<i64: 1, 8, 1>}, {transform_indices = @transform_1, window_bounds = array<i64: 1, 1, 8>}, {transform_indices = @transform_2, window_bounds = array<i64: 1, 8, 8>}]} {
    %c0 = arith.constant 0 : index
    %c0_0 = arith.constant 0 : index
    %c0_1 = arith.constant 0 : index
    %0 = vector.load %arg3[%c0, %c0_0, %c0_1] : memref<1x8x1xf32, #tpu.memory_space<vmem>>, vector<1x8x1xf32>
    %1 = vector.shape_cast %0 : vector<1x8x1xf32> to vector<8x1xf32>
    %c0_2 = arith.constant 0 : index
    %c0_3 = arith.constant 0 : index
    %c0_4 = arith.constant 0 : index
    %2 = vector.load %arg4[%c0_2, %c0_3, %c0_4] : memref<1x1x8xf32, #tpu.memory_space<vmem>>, vector<1x1x8xf32>
    %3 = vector.shape_cast %2 : vector<1x1x8xf32> to vector<1x8xf32>
    %4 = vector.broadcast %1 : vector<8x1xf32> to vector<8x8xf32>
    %5 = vector.broadcast %3 : vector<1x8xf32> to vector<8x8xf32>
    %6 = arith.addf %4, %5 : vector<8x8xf32>
    %c0_5 = arith.constant 0 : index
    %c0_6 = arith.constant 0 : index
    %c0_7 = arith.constant 0 : index
    %7 = vector.load %arg5[%c0_5, %c0_6, %c0_7] : memref<1x8x8xf32, #tpu.memory_space<vmem>>, vector<1x8x8xf32>
    %8 = vector.shape_cast %7 : vector<1x8x8xf32> to vector<8x8xf32>
    %9 = vector.shape_cast %6 : vector<8x8xf32> to vector<1x8x8xf32>
    tpu.vector_store %arg5[%c0_5, %c0_6, %c0_7], %9 {strides = array<i32>} : memref<1x8x8xf32, #tpu.memory_space<vmem>>, vector<1x8x8xf32>,
    return
  }
  func.func @transform_0(%arg0: i32, %arg1: i32, %arg2: i32) -> (i32, i32, i32) {
    %c0_i32 = arith.constant 0 : i32
    %c0_i32_0 = arith.constant 0 : i32
    return %arg0, %arg1, %c0_i32 : i32, i32, i32
  }
  func.func @transform_1(%arg0: i32, %arg1: i32, %arg2: i32) -> (i32, i32, i32) {
    %c0_i32 = arith.constant 0 : i32
    %c0_i32_0 = arith.constant 0 : i32
    return %arg0, %c0_i32, %arg2 : i32, i32, i32
  }
  func.func @transform_2(%arg0: i32, %arg1: i32, %arg2: i32) -> (i32, i32, i32) {
    %c0_i32 = arith.constant 0 : i32
    return %arg0, %arg1, %arg2 : i32, i32, i32
  }
}

</mosaic_0001>

<bundles_post_ra>
// kernel: distance_matrix_predictor.3
= control target key start
LH: loop header
LB: loop body
LE: loop exit
PB: predicated region body
PF: predicated region fallthrough
CT: control target
= control target key end

     0   :  { %7 = vsyncpa [#allocation3], 0  ;;  %s583_s0 = inlined_call_operand.vmem [shape: f32[2,8,1], index: 0, kind: input, shape index: {}]   ;;  %s584_s1 = inlined_call_operand.vmem [shape: f32[2,1,8], index: 1, kind: input, shape index: {}]   ;;  %s585_s2 = inlined_call_operand.hbm [shape: f32[2,8,8], index: 2, kind: output, shape index: {}]  }
   0x1   :  { %9 = vsyncpa [#allocation3 + $0x1], 0  ;;  %s481_s9 = smov 0   ;;  %s483_s10 = smov 0  }
   0x2   :  { %s485_s11 = smov 0   ;;  %s487_s12 = smov 0  }
   0x3   :  { %s489_s13 = smov 0   ;;  %s491_s14 = smov 0  }
   0x4 LB: > { %s317_s15 = sadd.s32 4294967295, %s462_s14   ;;  %s318_s16 = sadd.s32 4294967294, %s462_s14   ;;  %s462_s14 = sphi %s491_s14, %s15_s14   ;;  %s458_s13 = sphi %s489_s13, %s592_s13   ;;  %s454_s12 = sphi %s487_s12, %s591_s12   ;;  %s450_s11 = sphi %s485_s11, %s590_s11   ;;  %s446_s10 = sphi %s483_s10, %s589_s10   ;;  %s442_s9 = sphi %s481_s9, %s588_s9  }
   0x5   : > { %s34_s17 = sadd.s32 1, %s458_s13  ;;  %s101_s18 = sadd.s32 1, %s450_s11 }
   0x6   : > { %p36_p0 = scmp.ge.s32.totalorder %s34_s17, 2  ;;  %p111_p1 = scmp.ne.s32.totalorder %s450_s11, %s446_s10 }
   0x7   : > { %p112_p2 = scmp.eq.s32.totalorder %s317_s15, 1  ;;  %p117_p3 = scmp.ne.s32.totalorder %s446_s10, %s442_s9 }
   0x8   : > { %s594_s17 = smov (%p36_p0, %s34_s17), 0  ;;  %p118_p5 = scmp.eq.s32.totalorder %s318_s16, 1 }
   0x9   : > { %p521_p4 = por %p112_p2, %p111_p1  ;;  %s94_s20 = ssub.s32 %s458_s13, %s594_s17 }
   0xa   : > { %p321_p6 = scmp.ge.s32.totalorder %s462_s14, 1  ;;  %p99_p7 = scmp.eq.s32.totalorder %s94_s20, 0 }
   0xb   : > { %p528_p8 = por %p118_p5, %p117_p3  ;;  %p155_p9 = scmp.lt.s32.totalorder %s462_s14, 3 }
   0xc   : > { %s534_s22 = scalar_select %p99_p7, %s450_s11, %s101_s18  }
   0xd   : > { %p156_p10 = pnand %p321_p6, %p155_p9 }
   0xe   : > { %p185_p11 = scmp.lt.s32.totalorder (!%p156_p10), %s454_s12, 1  ;;  %s182_s28 = sand.u32 (!%p156_p10), 1, %s446_s10  }
   0xf   : > { %159 = sbr.rel (%p156_p10) target bundleno = 164 (0xa4), region = 28  ;;  %s322_s29 = sshll.u32 (!%p156_p10), %s182_s28, 3 }
  0x10   : > { %s326_s5 = sshll.u32 (!%p156_p10), %s454_s12, 7  ;;  %s184_s6 = scalar_lea.vmem (!%p156_p10), [#allocation2], %s322_s29 }
  0x11   : > { %s230_s7 = sshll.u32 (!%p156_p10), %s184_s6, 4  ;;  %s228_s16 = scalar_lea.hbm (!%p156_p10), %s585_s2, %s326_s5  ;;  %s231_s7 = int_to_ptr.vmem [resolvable:$true] %s230_s7 }
  0x12   : > { %s215_s18 = scalar_lea.sflag (!%p156_p10), [#allocation3], %s182_s28  ;;  %s386_s20 = scalar_lea.vmem (!%p156_p10), %s231_s7, 128 }
  0x13   : > { %p387_p12 = scmp.ne.s32.totalorder (!%p156_p10), %s231_s7, %s386_s20 }
  0x14   : > { %v464_v0 = vmov 0   ;;  %s186_s23 = scalar_select %p185_p11, %s454_s12, 1  ;;  %vm212_vm0 = vcmask 64512  }
  0x15   : > { %385 = vset.pattern.permute.xlu0 %v464_v0  ;;  %p388_p13 = pnand %p387_p12, %p521_p4 }
  0x16   : > { %s323_s24 = sshll.u32 %s186_s23, 3  ;;  %s197_s4 = scalar_lea.vmem %s584_s1, %s186_s23 }
  0x17   : > { %s191_s27 = scalar_lea.vmem %s583_s0, %s323_s24  ;;  %v324_v2 = vld [vmem:[%s197_s4] ss:$0 sm:$0xff]  ;;  %p389_p0 = pneg %p388_p13 }
  0x18   : > { %v198_v1 = vld [vmem:[%s191_s27] sm:$0xff]  ;;  %s465_s23 = smov [#allocation2]  }
  0x19   : > { %202 = vperm.xlu0 %385, %v198_v1   ;;  %s390_s24 = sshll.u32 %s465_s23, 4  ;;  %s391_s24 = int_to_ptr.vmem [resolvable:$false] %s390_s24 }
  0x1a   : > { %s392_s12 = scalar_lea.vmem %s391_s24, 256  ;;  %p393_p1 = scmp.lt.s32.totalorder %s231_s7, %s391_s24 }
  0x1b   : > { %p394_p2 = scmp.lt.s32.totalorder %s392_s12, %s386_s20 }
  0x1d   : > { %p395_p3 = por %p394_p2, %p393_p1 }
  0x1f   : > { %p396_p5 = pnand %p395_p3, %p389_p0 }
  0x94   : > { %v203_v3 = vpop.permute.xlu0 %202 }
  0x95   : > { %v211_v4 = vadd.f32 %v324_v2, %v203_v3 }
  0x97   : > { %213 = vst.msk [vmem:[%s184_s6] sm:$0xff] %vm212_vm0, %v211_v4 }
  0x98   : > { %399 = shalt.err (!%p396_p5)
}
  0x99   : > { %s400_s25 = scalar_lea.hbm %s228_s16, 128  ;;  %s404_s28 = scalar_lea.hbm %s585_s2, 256 }
  0x9a   : > { %p401_p6 = scmp.ne.s32.totalorder %s228_s16, %s400_s25  ;;  %p405_p10 = scmp.lt.s32.totalorder %s228_s16, %s585_s2 }
  0x9b   : > { %p406_p11 = scmp.lt.s32.totalorder %s404_s28, %s400_s25 }
  0x9c   : > { %p402_p7 = pnand %p401_p6, %p521_p4 }
  0x9d   : > { %p407_p12 = por %p406_p11, %p405_p10 }
  0x9e   : > { %p403_p9 = pneg %p402_p7 }
  0xa0   : > { %p408_p13 = pnand %p407_p12, %p403_p9 }
  0xa2   : > { %411 = shalt.err (!%p408_p13)
}
  0xa3   : > { %329 = dma.vmem_to_hbm [thread:$0]  (%p521_p4), %s231_s7, 128, %s228_s16, %s215_s18  }
  0xa4 PF: > { %p335_p0 = scmp.ge.s32.totalorder %s462_s14, 2  ;;  %s242_s3 = sand.u32 1, %s442_s9  }
  0xa5   : > { %s243_s4 = scalar_lea.sflag [#allocation3], %s242_s3 }
  0xa6   : > { %p332_p1 = pnand %p335_p0, %p528_p8 }
  0xa8   : > { %p333_p2 = pneg %p332_p1 }
  0xaa   : > { %437 = dma.done.wait (%p333_p2), %s243_s4, 128  }
  0xab   : > { %439 = vsyncadd (%p333_p2), %s243_s4, 4294967168  ;;  %s15_s14 = sadd.s32 1, %s462_s14   ;;  %s588_s9 = smov %s446_s10 }
  0xac   : > { %p12_p3 = scmp.ge.s32.totalorder %s15_s14, 4   ;;  %s589_s10 = smov %s450_s11 }
  0xad   : > { %s590_s11 = smov %s534_s22  ;;  %s591_s12 = smov %s458_s13 }
  0xae   : > { %s592_s13 = smov %s594_s17  ;;  %14 = sbr.rel (!%p12_p3) target bundleno = 4 (0x4), region = 66 }
  0xb3   :  { %248 = vsyncpa [#allocation3], 1 }
  0xb4   :  { %250 = vsyncpa [#allocation3 + $0x1], 1 }

// kernel: distance_matrix_predictor.2
= control target key start
LH: loop header
LB: loop body
LE: loop exit
PB: predicated region body
PF: predicated region fallthrough
CT: control target
= control target key end

     0   :  { %s643_s18 = smov 0   ;;  %s645_s19 = smov 0   ;;  %s724_s0 = inlined_call_operand.vmem [shape: f32[2,8,20], index: 0, kind: input, shape index: {}]   ;;  %s725_s1 = inlined_call_operand.vmem [shape: f32[20,64], index: 1, kind: input, shape index: {}]   ;;  %s726_s2 = inlined_call_operand.vmem [shape: f32[1,64], index: 2, kind: input, shape index: {}]   ;;  %s727_s3 = inlined_call_operand.vmem [shape: f32[64,2], index: 3, kind: input, shape index: {}]   ;;  %s728_s4 = inlined_call_operand.vmem [shape: f32[1,2], index: 4, kind: input, shape index: {}]   ;;  %s729_s5 = inlined_call_operand.vmem [shape: f32[2,8,2], index: 5, kind: output, shape index: {}]  }
   0x1   :  { %s647_s20 = smov 0  }
   0x2 LB: > { %s27_s21 = sadd.s32 1, %s605_s19  ;;  %p510_p0 = scmp.ge.s32.totalorder %s609_s20, 1  ;;  %s609_s20 = sphi %s647_s20, %s15_s20   ;;  %s605_s19 = sphi %s645_s19, %s731_s19   ;;  %s601_s18 = sphi %s643_s18, %s730_s18  }
   0x3   : > { %p29_p1 = scmp.ge.s32.totalorder %s27_s21, 2  ;;  %p205_p2 = scmp.lt.s32.totalorder %s609_s20, 3 }
   0x5   : > { %s733_s21 = smov (%p29_p1, %s27_s21), 0  ;;  %p206_p3 = pnand %p510_p0, %p205_p2 }
   0x6   : > { %p237_p4 = scmp.lt.s32.totalorder (!%p206_p3), %s601_s18, 1 }
   0x7   : > { %209 = sbr.rel (%p206_p3) target bundleno = 413 (0x19d), region = 40 }
   0xc   : > { %v254_v0 = vld [vmem:[%s725_s1 + $0x10] sm:$0xf]  ;;  %vm266_vm0 = vcmask 1043456   ;;  %v611_v1 = vmov 0.0   ;;  %v253_v2 = vld [vmem:[%s725_s1 + $0x8] sm:$0xff]  ;;  %v348_v3 = vld [vmem:[%s727_s3 + $0x38] sm:$0xff] }
   0xd   : > { %533 = vmatprep.subr.mxu0 %v611_v1  ;;  %542 = vmatprep.subr.mxu1 %v611_v1  ;;  %vm612_vm1 = vmmov 0   ;;  %v347_v4 = vld [vmem:[%s727_s3 + $0x30] sm:$0xff]  ;;  %v252_v5 = vld [vmem:[%s725_s1] sm:$0xff]  ;;  %s735_s18 = smov (!%p237_p4, %s601_s18), 1  ;;  %v346_v6 = vld [vmem:[%s727_s3 + $0x28] sm:$0xff]  ;;  %vm262_vm2 = vcmask 162816  }
   0xe   : > { %534 = vmatpush3.msk.msra.mxu0 %vm266_vm0, %v254_v0  ;;  %539 = vmatprep.mubr.msk.f32.mxu0 %vm612_vm1, %v611_v1  ;;  %s511_s9 = sshll.u32 %s735_s18, 3  ;;  %v345_v7 = vld [vmem:[%s727_s3 + $0x20] sm:$0xff]  ;;  %v344_v9 = vld [vmem:[%s727_s3 + $0x18] sm:$0xff]  ;;  %v343_v10 = vld [vmem:[%s727_s3 + $0x10] sm:$0xff]  ;;  %vm356_vm3 = vcmask 523264   ;;  %vm430_vm4 = vcmask 15360  }
   0xf   : > { %535 = vmatprep.subr.mxu0 %v611_v1  ;;  %543 = vmatpush3.msra.mxu1 %v348_v3  ;;  %s243_s12 = scalar_lea.vmem %s724_s0, %s511_s9  ;;  %v342_v11 = vld [vmem:[%s727_s3 + $0x8] sm:$0xff]  ;;  %v341_v12 = vld [vmem:[%s727_s3] sm:$0xff]  ;;  %s250_s8 = scalar_lea.vmem %s729_s5, %s511_s9 }
  0x10   : > { %536 = vmatpush3.msra.mxu0 %v253_v2  ;;  %544 = vmatprep.subr.mxu1 %v611_v1  ;;  %v251_v8 = vld [vmem:[%s243_s12] sm:$0xff] }
  0x11   : > { %537 = vmatprep.subr.mxu0 %v611_v1  ;;  %545 = vmatpush3.msra.mxu1 %v347_v4  ;;  %v513_v13 = vld [vmem:[%s726_s2] ss:$0 sm:$0xff] }
  0x12   : > { %538 = vmatpush3.msra.mxu0 %v252_v5  ;;  %546 = vmatprep.subr.mxu1 %v611_v1  ;;  %v516_v18 = vld [vmem:[%s728_s4] ss:$0 sm:$0xff] }
  0x13   : > { %547 = vmatpush3.msra.mxu1 %v346_v6  ;;  %558 = vmatprep.mubr.msk.f32.mxu1 %vm612_vm1, %v611_v1 }
  0x14   : > { %540 = vmatmul.mubr.msk.f32.vlgmr.msra.gmra.mxu0 %vm262_vm2, %v251_v8  ;;  %548 = vmatprep.subr.mxu1 %v611_v1 }
  0x15   : > { %549 = vmatpush3.msra.mxu1 %v345_v7 }
  0x16   : > { %550 = vmatprep.subr.mxu1 %v611_v1 }
  0x17   : > { %551 = vmatpush3.msra.mxu1 %v344_v9 }
  0x18   : > { %552 = vmatprep.subr.mxu1 %v611_v1 }
  0x19   : > { %553 = vmatpush3.msra.mxu1 %v343_v10 }
  0x1a   : > { %554 = vmatprep.subr.mxu1 %v611_v1 }
  0x1b   : > { %555 = vmatpush3.msra.mxu1 %v342_v11 }
  0x1c   : > { %556 = vmatprep.subr.mxu1 %v611_v1 }
  0x1d   : > { %557 = vmatpush3.msra.mxu1 %v341_v12 }
  0xd4   : > { %v336_v14 = vpop.f32.mrf.mxu0 }
  0xd5   : > { %v337_v15 = vadd.f32 %v513_v13, %v336_v14 }
  0xd6   : > { %v541_v16 = vpop.f32.mrf.mxu0 }
  0xd7   : > { %v340_v17 = vmax.f32 %v337_v15, 0.0 }
  0xd9   : > { %559 = vmatmul.mubr.msk.f32.vlgmr.msra.gmra.mxu1 %vm356_vm3, %v340_v17 }
 0x199   : > { %v426_v19 = vpop.f32.mrf.mxu1 }
 0x19a   : > { %v427_v20 = vadd.f32 %v516_v18, %v426_v19 }
 0x19b   : > { %v560_v21 = vpop.f32.mrf.mxu1 }
 0x19c   : > { %431 = vst.msk [vmem:[%s250_s8] sm:$0xff] %vm430_vm4, %v427_v20 }
 0x19d PF: > { %s15_s20 = sadd.s32 1, %s609_s20   ;;  %s730_s18 = smov %s605_s19 }
 0x19e   : > { %p12_p5 = scmp.ge.s32.totalorder %s15_s20, 4   ;;  %s731_s19 = smov %s733_s21 }
 0x1a0   :  { %14 = sbr.rel (!%p12_p5) target bundleno = 2 (0x2), region = 70 }

</bundles_post_ra>
